<compile_context>
chip_gen: v6e
topology: v6e:2x2x1
jax: 0.10.0
libtpu: 0.0.40
codegen_flags: <defaults>
</compile_context>

<pallas_src>
import jax
import jax.numpy as jnp
import numpy as np
from jax.experimental import pallas as pl
from jax.experimental.pallas import tpu as pltpu


def _rec_attention_kernel(x_ref, ctx_ref, repres_ref, alpha_ref):
    # x_ref:      (TB, S, H)
    # ctx_ref:    (1, H)       shared context vector (row layout)
    # repres_ref: (TB, H)      sublane-dense
    # alpha_ref:  (TB, S)      lane-dense along S
    x = x_ref[...]
    tb, s, h = x.shape
    xf = x.astype(jnp.float32)
    ctx = ctx_ref[...].astype(jnp.float32)                 # (1, H)

    # scores[b, s] = <x[b, s, :], ctx>
    # VPU broadcast-mul + lane reduce: avoids a degenerate M=1 batched MXU
    # matmul (and its implicit per-batch relayout of the (S,H) subtile).
    scores = jnp.sum(xf * ctx[None, :, :], axis=-1)        # (TB, S)

    # Numerically-stable softmax over S (last / lane axis).
    m = jnp.max(scores, axis=-1, keepdims=True)            # (TB, 1)
    e = jnp.exp(scores - m)                                 # (TB, S)
    denom = jnp.sum(e, axis=-1, keepdims=True)              # (TB, 1)
    # Exact reciprocal (full-precision divide path) -- keeps 1e-5 rtol; the
    # approx=True EUP path is cheaper but lower precision.
    inv_denom = pl.reciprocal(denom, approx=False)
    alpha = e * inv_denom                                    # (TB, S)

    # repres[b, h] = sum_s alpha[b, s] * x[b, s, h]
    if h < 128:
        # Small H: broadcast-mul + sublane reduce (VPU/XLU); MXU row
        # utilization would be <1% for K=S, N=H this small.
        repres = jnp.sum(alpha[:, :, None] * xf, axis=1)    # (TB, H)
    else:
        repres = jnp.einsum("bs,bsh->bh", alpha, xf,
                            preferred_element_type=jnp.float32)

    repres_ref[...] = repres.astype(repres_ref.dtype)
    alpha_ref[...] = alpha.astype(alpha_ref.dtype)


def _round_up(x, m):
    return ((x + m - 1) // m) * m


def _choose_tiling(B, S, H, dtype):
    """Pick (TB, steps, B_pad, vmem_bytes) from the PADDED VMEM footprint.

    Targets ~8 MiB padded input blocks (amortizes the ~0.35 us per-step
    overhead) while capping the double-buffered total (input + both outputs)
    at ~40 MiB so it fits v7x's 64 MiB physical VMEM with headroom; the
    explicit vmem_limit_bytes in the wrapper covers v5e's 16 MiB scoped
    default."""
    itemsize = jnp.dtype(dtype).itemsize
    sub = 8 * max(1, 4 // itemsize)              # sublane tile: f32->8, bf16->16
    in_row = _round_up(S, sub) * _round_up(H, 128) * itemsize
    out_row = (_round_up(S, 128) + _round_up(H, 128)) * itemsize
    per_batch = in_row + out_row

    target_in = 8 << 20
    cap_double_buffered = 40 << 20
    tb = max(1, min(target_in // max(in_row, 1),
                    cap_double_buffered // max(2 * per_batch, 1)))
    tb = min(tb, B)
    if tb < B:
        # Keep TB a multiple of the sublane tile so the (TB,S)/(TB,H) output
        # blocks store unmasked; a full-batch block is always legal.
        tb = max(sub, (tb // sub) * sub)

    steps = pl.cdiv(B, tb)
    # v7x has 2 TensorCores: keep the "parallel" grid >= 2 (even, best effort)
    # whenever the batch is big enough that sub-aligned halves exist.
    if steps == 1 and B >= 2 * sub:
        tb = _round_up(pl.cdiv(B, 2), sub)
    elif steps > 1 and steps % 2 == 1 and steps <= 64:
        tb = max(sub, _round_up(pl.cdiv(B, steps + 1), sub))
    steps = pl.cdiv(B, tb)
    b_pad = steps * tb

    # Double-buffered block footprint (+ the tiny ctx block).
    vmem_bytes = 2 * tb * per_batch + 2 * _round_up(H, 128) * itemsize
    return tb, steps, b_pad, vmem_bytes


def rec_attention_forward(iput, bin_context_vector):
    """iput: (B, S, H), bin_context_vector: (H, 1).  Returns (repres, alpha)
    with repres: (B, 1, H) and alpha: (B, S), matching the PyTorch module."""
    B, S, H = iput.shape
    ctx_row = bin_context_vector.reshape(1, H)
    TB, steps, b_pad, vmem_bytes = _choose_tiling(B, S, H, iput.dtype)

    x = iput
    if b_pad != B:
        # Pad batch so the grid covers it exactly (padded rows are discarded).
        x = jnp.pad(iput, ((0, b_pad - B), (0, 0), (0, 0)))

    itemsize = jnp.dtype(iput.dtype).itemsize
    cost = pl.CostEstimate(
        flops=4 * B * S * H,                       # two B*S*H contractions
        transcendentals=B * S,                     # exp in the softmax
        bytes_accessed=(B * S * H + B * (S + H) + H) * itemsize,
    )
    vmem_limit = int(min(48 << 20, max(16 << 20, 2 * vmem_bytes)))

    # TODO(synk): for very long S (a single (TB,S,H) block would not fit VMEM,
    # worst on v7x's 64 MiB), add a second "arbitrary" grid axis over S with an
    # online-softmax m/l/acc accumulator; not needed at these shapes.
    repres2d, alpha_pad = pl.pallas_call(
        _rec_attention_kernel,
        out_shape=(
            jax.ShapeDtypeStruct((b_pad, H), iput.dtype),
            jax.ShapeDtypeStruct((b_pad, S), iput.dtype),
        ),
        grid=(steps,),
        in_specs=[
            pl.BlockSpec((TB, S, H), lambda b: (b, 0, 0)),
            pl.BlockSpec((1, H), lambda b: (0, 0)),
        ],
        out_specs=(
            pl.BlockSpec((TB, H), lambda b: (b, 0)),
            pl.BlockSpec((TB, S), lambda b: (b, 0)),
        ),
        compiler_params=pltpu.CompilerParams(
            dimension_semantics=("parallel",),
            vmem_limit_bytes=vmem_limit,
        ),
        cost_estimate=cost,
    )(x, ctx_row)

    repres = repres2d[:B].reshape(B, 1, H)   # free metadata reshape
    alpha = alpha_pad[:B]
    return repres, alpha


def _reference(iput, ctx):
    # pure-JAX reference mirroring the PyTorch forward
    scores = jnp.einsum("bsh,hk->bsk", iput, ctx)[..., 0]           # (B, S)
    alpha = jax.nn.softmax(scores, axis=1)                           # (B, S)
    repres = jnp.einsum("bs,bsh->bh", alpha, iput)[:, None, :]       # (B, 1, H)
    return repres, alpha


if __name__ == "__main__":
    # args.bin_rnn_size = 32, hm=True (or unidirectional) -> bin_rep_size = 32
    B, S, H = 2, 8, 32

    key = jax.random.PRNGKey(0)
    k_x, k_ctx = jax.random.split(key)
    iput = jax.random.normal(k_x, (B, S, H), dtype=jnp.float32)
    # nn.Parameter(torch.Tensor(H, 1)).uniform_(-0.1, 0.1)
    bin_context_vector = jax.random.uniform(
        k_ctx, (H, 1), dtype=jnp.float32, minval=-0.1, maxval=0.1
    )

    repres, alpha = rec_attention_forward(iput, bin_context_vector)
    jax.block_until_ready((repres, alpha))

    repres_ref, alpha_ref = _reference(iput, bin_context_vector)
    assert repres.shape == (B, 1, H) and alpha.shape == (B, S)
    np.testing.assert_allclose(np.asarray(repres), np.asarray(repres_ref),
                               rtol=1e-5, atol=1e-5)
    np.testing.assert_allclose(np.asarray(alpha), np.asarray(alpha_ref),
                               rtol=1e-5, atol=1e-5)

    print("KERNEL_OK")
</pallas_src>

<mosaic_0001>
module attributes {stable_mosaic.version = 11 : i64} {
  func.func @_rec_attention_kernel(%arg0: i32, %arg1: memref<2x8x32xf32, #tpu.memory_space<vmem>>, %arg2: memref<1x32xf32, #tpu.memory_space<vmem>>, %arg3: memref<2x32xf32, #tpu.memory_space<vmem>>, %arg4: memref<2x8xf32, #tpu.memory_space<vmem>>) attributes {dimension_semantics = [#tpu.dimension_semantics<parallel>], iteration_bounds = array<i64: 1>, scalar_prefetch = 0 : i64, scratch_operands = 0 : i64, tpu.core_type = #tpu.core_type<tc>, window_params = [{transform_indices = @transform_0, window_bounds = array<i64: 2, 8, 32>}, {pipeline_mode = #tpu.pipeline_mode<synchronous>, transform_indices = @transform_1, window_bounds = array<i64: 1, 32>}, {transform_indices = @transform_2, window_bounds = array<i64: 2, 32>}, {transform_indices = @transform_3, window_bounds = array<i64: 2, 8>}]} {
    %c0 = arith.constant 0 : index
    %c0_0 = arith.constant 0 : index
    %c0_1 = arith.constant 0 : index
    %0 = vector.load %arg1[%c0, %c0_0, %c0_1] : memref<2x8x32xf32, #tpu.memory_space<vmem>>, vector<2x8x32xf32>
    %c0_2 = arith.constant 0 : index
    %c0_3 = arith.constant 0 : index
    %1 = vector.load %arg2[%c0_2, %c0_3] : memref<1x32xf32, #tpu.memory_space<vmem>>, vector<1x32xf32>
    %2 = vector.shape_cast %1 : vector<1x32xf32> to vector<1x1x32xf32>
    %3 = vector.broadcast %2 : vector<1x1x32xf32> to vector<2x8x32xf32>
    %4 = arith.mulf %0, %3 : vector<2x8x32xf32>
    %cst = arith.constant dense<0.000000e+00> : vector<2x8xf32>
    %5 = vector.multi_reduction <add>, %4, %cst [2] : vector<2x8x32xf32> to vector<2x8xf32>
    %cst_4 = arith.constant dense<0xFF800000> : vector<2xf32>
    %6 = vector.multi_reduction <maximumf>, %5, %cst_4 [1] : vector<2x8xf32> to vector<2xf32>
    %7 = vector.shape_cast %6 : vector<2xf32> to vector<2x1xf32>
    %8 = vector.broadcast %7 : vector<2x1xf32> to vector<2x8xf32>
    %9 = arith.subf %5, %8 : vector<2x8xf32>
    %10 = math.exp %9 : vector<2x8xf32>
    %cst_5 = arith.constant dense<0.000000e+00> : vector<2xf32>
    %11 = vector.multi_reduction <add>, %10, %cst_5 [1] : vector<2x8xf32> to vector<2xf32>
    %12 = vector.shape_cast %11 : vector<2xf32> to vector<2x1xf32>
    %13 = tpu.reciprocal %12 : vector<2x1xf32> -> vector<2x1xf32>
    %14 = vector.broadcast %13 : vector<2x1xf32> to vector<2x8xf32>
    %15 = arith.mulf %10, %14 : vector<2x8xf32>
    %16 = vector.shape_cast %15 : vector<2x8xf32> to vector<2x8x1xf32>
    %17 = vector.broadcast %16 : vector<2x8x1xf32> to vector<2x8x32xf32>
    %18 = arith.mulf %17, %0 : vector<2x8x32xf32>
    %cst_6 = arith.constant dense<0.000000e+00> : vector<2x32xf32>
    %19 = vector.multi_reduction <add>, %18, %cst_6 [1] : vector<2x8x32xf32> to vector<2x32xf32>
    %c0_7 = arith.constant 0 : index
    %c0_8 = arith.constant 0 : index
    %20 = vector.load %arg3[%c0_7, %c0_8] : memref<2x32xf32, #tpu.memory_space<vmem>>, vector<2x32xf32>
    tpu.vector_store %arg3[%c0_7, %c0_8], %19 {strides = array<i32>} : memref<2x32xf32, #tpu.memory_space<vmem>>, vector<2x32xf32>,
    %c0_9 = arith.constant 0 : index
    %c0_10 = arith.constant 0 : index
    %21 = vector.load %arg4[%c0_9, %c0_10] : memref<2x8xf32, #tpu.memory_space<vmem>>, vector<2x8xf32>
    tpu.vector_store %arg4[%c0_9, %c0_10], %15 {strides = array<i32>} : memref<2x8xf32, #tpu.memory_space<vmem>>, vector<2x8xf32>,
    return
  }
  func.func @transform_0(%arg0: i32) -> (i32, i32, i32) {
    %c0_i32 = arith.constant 0 : i32
    %c0_i32_0 = arith.constant 0 : i32
    %c0_i32_1 = arith.constant 0 : i32
    return %arg0, %c0_i32, %c0_i32_0 : i32, i32, i32
  }
  func.func @transform_1(%arg0: i32) -> (i32, i32) {
    %c0_i32 = arith.constant 0 : i32
    %c0_i32_0 = arith.constant 0 : i32
    %c0_i32_1 = arith.constant 0 : i32
    return %c0_i32, %c0_i32_0 : i32, i32
  }
  func.func @transform_2(%arg0: i32) -> (i32, i32) {
    %c0_i32 = arith.constant 0 : i32
    %c0_i32_0 = arith.constant 0 : i32
    return %arg0, %c0_i32 : i32, i32
  }
  func.func @transform_3(%arg0: i32) -> (i32, i32) {
    %c0_i32 = arith.constant 0 : i32
    %c0_i32_0 = arith.constant 0 : i32
    return %arg0, %c0_i32 : i32, i32
  }
}

</mosaic_0001>

<bundles_post_ra>
// kernel: tpu_custom_call.1
= control target key start
LH: loop header
LB: loop body
LE: loop exit
PB: predicated region body
PF: predicated region fallthrough
CT: control target
= control target key end

     0   :  { %9 = vsyncpa [#allocation3], 0  ;;  %s320_s0 = inlined_call_operand.hbm [shape: f32[2,8,32], index: 0, kind: input, shape index: {}]   ;;  %s321_s1 = inlined_call_operand.vmem [shape: f32[1,32], index: 1, kind: input, shape index: {}]   ;;  %s322_s2 = inlined_call_operand.hbm [shape: f32[2,32], index: 2, kind: output, shape index: {0}]   ;;  %s323_s3 = inlined_call_operand.hbm [shape: f32[2,8], index: 3, kind: output, shape index: {1}]  }
   0x1   :  { %10 = vsyncpa [#allocation4], 0 }
   0x2   :  { %11 = vsyncpa [#allocation7], 0  ;;  %s271_s12 = smov [#allocation2]  }
   0x3   :  { %s17_s13 = sshll.u32 %s271_s12, 4  ;;  %s18_s13 = int_to_ptr.vmem [resolvable:$true] %s17_s13 }
   0x4   :  { %s213_s14 = scalar_lea.vmem %s18_s13, 256  ;;  %p218_p1 = scmp.lt.s32.totalorder %s18_s13, %s18_s13 }
   0x5   :  { %p214_p0 = scmp.ne.s32.totalorder %s18_s13, %s213_s14  ;;  %p219_p2 = scmp.lt.s32.totalorder %s213_s14, %s213_s14 }
   0x7   :  { %p220_p3 = por %p219_p2, %p218_p1 }
   0x9   :  { %p221_p4 = pnand %p220_p3, %p214_p0 }
   0xb   :  { %224 = shalt.err (!%p221_p4)
}
   0xc   :  { %s272_s15 = smov 128   ;;  %s273_s16 = smov 8  }
   0xd   :  { %23 = dma.hbm_to_vmem [thread:$0]  %s320_s0, 256, %s18_s13, [#allocation3], %s272_s15, %s272_s15, %s273_s16  }
   0xe   :  { %265 = dma.done.wait [#allocation3], 256  }
   0xf   :  { %266 = vsyncadd [#allocation3], 4294967040  ;;  %v29_v0 = vld [vmem:[#allocation2] sm:$0xff]  ;;  %vm40_vm0 = vcmask 261120   ;;  %v30_v2 = vld [vmem:[#allocation2 + $0x8] sm:$0xff]  ;;  %v49_v7 = vlaneseq  ;;  %vm59_vm1 = vcmask 1041409  }
  0x10   :  { %v190_v1 = vld [vmem:[%s321_s1] ss:$0 sm:$0xff]  ;;  %vm62_vm2 = vcmask 58368   ;;  %v274_v17 = vmov 0   ;;  %s275_s0 = smov [#allocation6]  }
  0x11   :  { %v38_v3 = vmul.f32 %v190_v1, %v29_v0  ;;  %v39_v4 = vmul.f32 %v190_v1, %v30_v2  ;;  %v50_v8 = vand.u32 127, %v49_v7  ;;  %v52_v9 = vshrl.u32 %v49_v7, 7  ;;  %198 = vset.pattern.permute.xlu0 %v274_v17  ;;  %197 = vset.pattern.permute.xlu1 %v274_v17  ;;  %s177_s1 = sshll.u32 %s275_s0, 4  ;;  %s178_s1 = int_to_ptr.vmem [resolvable:$true] %s177_s1 }
  0x12   :  { %s225_s21 = scalar_lea.vmem %s178_s1, 32  ;;  %p230_p6 = scmp.lt.s32.totalorder %s178_s1, %s178_s1 }
  0x13   :  { %v41_v5 = vsel %vm40_vm0, %v38_v3, 0.0  ;;  %v44_v6 = vsel %vm40_vm0, %v39_v4, 0.0  ;;  %v53_v11 = vsub.s32 %v50_v8, %v52_v9  ;;  %v69_v18 = vsub.s32 0, %v52_v9  ;;  %p226_p5 = scmp.ne.s32.totalorder %s178_s1, %s225_s21  ;;  %p231_p7 = scmp.lt.s32.totalorder %s225_s21, %s225_s21 }
  0x14   :  { %42 = vadd.xlane.f32.xlu0 %v41_v5  ;;  %v73_v19 = vsub.s32 1, %v52_v9 }
  0x15   :  { %p232_p8 = por %p231_p7, %p230_p6 }
  0x17   :  { %p233_p9 = pnand %p232_p8, %p226_p5 }
  0x18   :  { %45 = vadd.xlane.f32.xlu0 %v44_v6 }
  0x9d   :  { %v43_v10 = vpop.xlane.xlu0 %42 }
  0x9e   :  { %v54_v13 = vrot.slane %v43_v10, %v53_v11 }
  0xa1   :  { %v46_v12 = vpop.xlane.xlu0 %45 }
  0xa2   :  { %v58_v14 = vrot.slane %v46_v12, %v53_v11 }
  0xa4   :  { %v60_v15 = vsel %vm59_vm1, %v58_v14, %v54_v13 }
  0xa5   :  { %v63_v16 = vsel %vm62_vm2, %v60_v15, -inf }
  0xa6   :  { %64 = vmax.xlane.f32.xlu1 %v63_v16 }
 0x12f   :  { %v65_v20 = vpop.xlane.xlu1 %64 }
 0x130   :  { %v70_v21 = vrot.slane %v65_v20, %v69_v18  ;;  %v74_v22 = vrot.slane %v65_v20, %v73_v19 }
 0x132   :  { %v77_v23 = vsub.f32 %v43_v10, %v70_v21  ;;  %v78_v24 = vsub.f32 %v46_v12, %v74_v22 }
 0x134   :  { %v79_v25 = vmul.f32 1.442695, %v77_v23  ;;  %v81_v26 = vmul.f32 1.442695, %v78_v24 }
 0x136   :  { %199 = vpow2.f32 %v79_v25 }
 0x137   :  { %201 = vpow2.f32 %v81_v26 }
 0x143   :  { %v200_v27 = vpop.eup %199 }
 0x144   :  { %v202_v28 = vpop.eup %201  ;;  %86 = vperm.xlu1 %197, %v200_v27  }
 0x145   :  { %89 = vperm.xlu0 %198, %v202_v28  }
 0x1bf   :  { %v87_v29 = vpop.permute.xlu1 %86 }
 0x1c0   :  { %v90_v30 = vpop.permute.xlu0 %89  ;;  %v94_v31 = vrot.slane %v87_v29, %v53_v11 }
 0x1c1   :  { %v98_v32 = vrot.slane %v90_v30, %v53_v11 }
 0x1c3   :  { %v99_v33 = vsel %vm59_vm1, %v98_v32, %v94_v31 }
 0x1c4   :  { %v101_v34 = vsel %vm62_vm2, %v99_v33, 0.0 }
 0x1c5   :  { %102 = vadd.xlane.f32.xlu1 %v101_v34 }
 0x24e   :  { %v103_v35 = vpop.xlane.xlu1 %102 }
 0x24f   :  { %203 = vrcp.f32 %v103_v35 }
 0x25c   :  { %v204_v36 = vpop.eup %203 }
 0x25d   :  { %v109_v37 = vrot.slane %v204_v36, %v69_v18  ;;  %v113_v39 = vrot.slane %v204_v36, %v73_v19 }
 0x25f   :  { %v116_v38 = vmul.f32 %v200_v27, %v109_v37  ;;  %v117_v40 = vmul.f32 %v202_v28, %v113_v39 }
 0x261   :  { %120 = vperm.xlu0 %198, %v116_v38  }
 0x265   :  { %125 = vperm.xlu0 %198, %v117_v40  }
 0x2dc   :  { %v121_v41 = vpop.permute.xlu0 %120 }
 0x2dd   :  { %v128_v42 = vmul.f32 %v121_v41, %v29_v0  ;;  %v153_v46 = vrot.slane %v121_v41, %v53_v11 }
 0x2df   :  { %v130_v43 = vsel %vm40_vm0, %v128_v42, 0.0 }
 0x2e0   :  { %v131_v44 = vrot.slane %v130_v43, 4  ;;  %v126_v45 = vpop.permute.xlu0 %125 }
 0x2e1   :  { %v129_v47 = vmul.f32 %v126_v45, %v30_v2  ;;  %v157_v48 = vrot.slane %v126_v45, %v53_v11 }
 0x2e2   :  { %v132_v49 = vadd.f32 %v131_v44, %v130_v43 }
 0x2e3   :  { %v137_v50 = vsel %vm40_vm0, %v129_v47, 0.0  ;;  %v158_v51 = vsel %vm59_vm1, %v157_v48, %v153_v46 }
 0x2e4   :  { %v133_v52 = vrot.slane %v132_v49, 2  ;;  %v138_v53 = vrot.slane %v137_v50, 4  ;;  %160 = vst.msk [vmem:[#allocation6] sm:$0x3] %vm62_vm2, %v158_v51 }
 0x2e5   :  { %236 = shalt.err (!%p233_p9)
}
 0x2e6   :  { %180 = dma.vmem_to_hbm [thread:$0]  %s178_s1, 32, %s323_s3, [#allocation7]   ;;  %v134_v54 = vadd.f32 %v133_v52, %v132_v49  ;;  %v139_v55 = vadd.f32 %v138_v53, %v137_v50  ;;  %vm148_vm3 = vcmask 254976  }
 0x2e7   :  { %s276_s24 = smov [#allocation5]  }
 0x2e8   :  { %v140_v56 = vrot.slane %v139_v55, 2  ;;  %v135_v57 = vrot.slane %v134_v54, 1  ;;  %s167_s25 = sshll.u32 %s276_s24, 4  ;;  %s168_s25 = int_to_ptr.vmem [resolvable:$true] %s167_s25 }
 0x2e9   :  { %s245_s26 = scalar_lea.vmem %s168_s25, 32  ;;  %p250_p11 = scmp.lt.s32.totalorder %s168_s25, %s168_s25 }
 0x2ea   :  { %v141_v58 = vadd.f32 %v140_v56, %v139_v55  ;;  %v136_v61 = vadd.f32 %v135_v57, %v134_v54  ;;  %p246_p10 = scmp.ne.s32.totalorder %s168_s25, %s245_s26  ;;  %p251_p12 = scmp.lt.s32.totalorder %s245_s26, %s245_s26 }
 0x2ec   :  { %v142_v59 = vrot.slane %v141_v58, 1  ;;  %p252_p13 = por %p251_p12, %p250_p11 }
 0x2ee   :  { %v143_v60 = vadd.f32 %v142_v59, %v141_v58  ;;  %p253_p0 = pnand %p252_p13, %p246_p10 }
 0x2f0   :  { %v146_v62 = vsel %vm59_vm1, %v143_v60, %v136_v61 }
 0x2f1   :  { %149 = vst.msk [vmem:[#allocation5] sm:$0x3] %vm148_vm3, %v146_v62 }
 0x2f2   :  { %256 = shalt.err (!%p253_p0)
}
 0x2f3   :  { %170 = dma.vmem_to_hbm [thread:$0]  %s168_s25, 32, %s322_s2, [#allocation4]  }
 0x2f4   :  { %267 = dma.done.wait [#allocation4], 32  }
 0x2f5   :  { %268 = vsyncadd [#allocation4], 4294967264 }
 0x2f6   :  { %269 = dma.done.wait [#allocation7], 32  }
 0x2f7   :  { %270 = vsyncadd [#allocation7], 4294967264 }
 0x2f8   :  { %187 = vsyncpa [#allocation3], 1 }
 0x2f9   :  { %188 = vsyncpa [#allocation4], 1 }
 0x2fa   :  { %189 = vsyncpa [#allocation7], 1 }

</bundles_post_ra>
